<compile_context>
chip_gen: v5e
topology: v5e:2x2
jax: 0.10.0
libtpu: 0.0.40
codegen_flags: <defaults>
</compile_context>

<pallas_src>
import jax
import jax.numpy as jnp
from jax.experimental import pallas as pl
from jax.experimental.pallas import tpu as pltpu


def _elu(x):
    # ELU(alpha=1): x if x > 0 else exp(x) - 1.
    # No clamp needed: the select discards the positive-branch exp (inf, not NaN).
    return jnp.where(x > 0, x, jnp.exp(x) - 1.0)


def _mlp_kernel(x_ref, w1_ref, b1_ref, w2_ref, b2_ref, w3_ref, b3_ref, out_ref):
    """One batch tile: 3 matmuls + 2 ELUs.  Weights are VMEM-resident."""
    x = x_ref[...]                                                     # (TB, dim)
    h = jnp.dot(x, w1_ref[...], preferred_element_type=jnp.float32) + b1_ref[...]
    h = _elu(h)                                                        # (TB, nhidden) f32
    h = jnp.dot(h.astype(w2_ref.dtype), w2_ref[...],
                preferred_element_type=jnp.float32) + b2_ref[...]
    h = _elu(h)                                                        # (TB, nhidden) f32
    o = jnp.dot(h.astype(w3_ref.dtype), w3_ref[...],
                preferred_element_type=jnp.float32) + b3_ref[...]
    out_ref[...] = o.astype(out_ref.dtype)                             # (TB, dim)


def initial_velocity_forward(x0, w1, b1, w2, b2, w3, b3, *, block_b=512):
    """Returns cat((x0, MLP(x0)), axis=0) with shape (2*B, dim)."""
    B, dim = x0.shape
    nhidden = w1.shape[1]

    # Batch tile: big tiles amortize per-step overhead; multiple of 8 for f32.
    # For small B the single full-extent block satisfies the (8,128) rule.
    tb = block_b if B > block_b else B
    grid = (pl.cdiv(B, tb),)

    # Weights/biases: full-extent blocks, constant index_map -> loaded once,
    # resident in VMEM for every grid step.
    def const_spec(shape):
        return pl.BlockSpec(shape, lambda i: tuple(0 for _ in shape))

    o = pl.pallas_call(
        _mlp_kernel,
        out_shape=jax.ShapeDtypeStruct((B, dim), x0.dtype),
        grid=grid,
        in_specs=[
            pl.BlockSpec((tb, dim), lambda i: (i, 0)),     # x0 tile
            const_spec((dim, nhidden)),                    # w1
            const_spec((1, nhidden)),                      # b1
            const_spec((nhidden, nhidden)),                # w2
            const_spec((1, nhidden)),                      # b2
            const_spec((nhidden, dim)),                    # w3
            const_spec((1, dim)),                          # b3
        ],
        out_specs=pl.BlockSpec((tb, dim), lambda i: (i, 0)),
        compiler_params=pltpu.CompilerParams(
            dimension_semantics=("parallel",)),            # v7x dual-TC sharding
    )(x0, w1, b1, w2, b2, w3, b3)

    # torch.cat((x0, out), dim=0) done in the wrapper: avoids re-streaming x0
    # through the kernel purely for the concatenation.
    return jnp.concatenate((x0, o), axis=0)


def _torch_linear_init(key, fan_in, fan_out):
    """nn.Linear default init: U(-1/sqrt(fan_in), 1/sqrt(fan_in)).
    Weight returned already transposed to (fan_in, fan_out)."""
    kw, kb = jax.random.split(key)
    bound = 1.0 / jnp.sqrt(jnp.float32(fan_in))
    w = jax.random.uniform(kw, (fan_in, fan_out), jnp.float32, -bound, bound)
    b = jax.random.uniform(kb, (1, fan_out), jnp.float32, -bound, bound)
    return w, b


def _reference(x0, w1, b1, w2, b2, w3, b3):
    h = _elu(x0 @ w1 + b1)
    h = _elu(h @ w2 + b2)
    o = h @ w3 + b3
    return jnp.concatenate((x0, o), axis=0)


if __name__ == "__main__":
    # Small shapes consistent with the module: dim features, nhidden hidden units.
    B, dim, nhidden = 8, 4, 32

    key = jax.random.PRNGKey(0)
    kx, k1, k2, k3 = jax.random.split(key, 4)

    x0 = jax.random.normal(kx, (B, dim), jnp.float32)
    w1, b1 = _torch_linear_init(k1, dim, nhidden)
    w2, b2 = _torch_linear_init(k2, nhidden, nhidden)
    w3, b3 = _torch_linear_init(k3, nhidden, dim)

    out = initial_velocity_forward(x0, w1, b1, w2, b2, w3, b3)
    out = jax.block_until_ready(out)

    ref = _reference(x0, w1, b1, w2, b2, w3, b3)
    assert out.shape == (2 * B, dim), out.shape
    assert jnp.allclose(out, ref, atol=1e-5, rtol=1e-5), "mismatch vs reference"

    print("KERNEL_OK")
</pallas_src>

<mosaic_0001>
module attributes {stable_mosaic.version = 11 : i64} {
  func.func @_mlp_kernel(%arg0: i32, %arg1: memref<8x4xf32, #tpu.memory_space<vmem>>, %arg2: memref<4x32xf32, #tpu.memory_space<vmem>>, %arg3: memref<1x32xf32, #tpu.memory_space<vmem>>, %arg4: memref<32x32xf32, #tpu.memory_space<vmem>>, %arg5: memref<1x32xf32, #tpu.memory_space<vmem>>, %arg6: memref<32x4xf32, #tpu.memory_space<vmem>>, %arg7: memref<1x4xf32, #tpu.memory_space<vmem>>, %arg8: memref<8x4xf32, #tpu.memory_space<vmem>>) attributes {dimension_semantics = [#tpu.dimension_semantics<parallel>], iteration_bounds = array<i64: 1>, scalar_prefetch = 0 : i64, scratch_operands = 0 : i64, tpu.core_type = #tpu.core_type<tc>, window_params = [{transform_indices = @transform_0, window_bounds = array<i64: 8, 4>}, {pipeline_mode = #tpu.pipeline_mode<synchronous>, transform_indices = @transform_1, window_bounds = array<i64: 4, 32>}, {pipeline_mode = #tpu.pipeline_mode<synchronous>, transform_indices = @transform_2, window_bounds = array<i64: 1, 32>}, {pipeline_mode = #tpu.pipeline_mode<synchronous>, transform_indices = @transform_3, window_bounds = array<i64: 32, 32>}, {pipeline_mode = #tpu.pipeline_mode<synchronous>, transform_indices = @transform_4, window_bounds = array<i64: 1, 32>}, {pipeline_mode = #tpu.pipeline_mode<synchronous>, transform_indices = @transform_5, window_bounds = array<i64: 32, 4>}, {pipeline_mode = #tpu.pipeline_mode<synchronous>, transform_indices = @transform_6, window_bounds = array<i64: 1, 4>}, {transform_indices = @transform_7, window_bounds = array<i64: 8, 4>}]} {
    %c0 = arith.constant 0 : index
    %c0_0 = arith.constant 0 : index
    %0 = vector.load %arg1[%c0, %c0_0] : memref<8x4xf32, #tpu.memory_space<vmem>>, vector<8x4xf32>
    %c0_1 = arith.constant 0 : index
    %c0_2 = arith.constant 0 : index
    %1 = vector.load %arg2[%c0_1, %c0_2] : memref<4x32xf32, #tpu.memory_space<vmem>>, vector<4x32xf32>
    %cst = arith.constant dense<0.000000e+00> : vector<8x32xf32>
    %2 = tpu.matmul %0, %1, %cst {dimension_numbers = #tpu.dot_dimension_numbers<[1], [0], [0], [1], [0, 0, 1, 1], [], []>} : vector<8x4xf32>, vector<4x32xf32>, vector<8x32xf32> -> vector<8x32xf32>
    %c0_3 = arith.constant 0 : index
    %c0_4 = arith.constant 0 : index
    %3 = vector.load %arg3[%c0_3, %c0_4] : memref<1x32xf32, #tpu.memory_space<vmem>>, vector<1x32xf32>
    %4 = vector.broadcast %3 : vector<1x32xf32> to vector<8x32xf32>
    %5 = arith.addf %2, %4 : vector<8x32xf32>
    %cst_5 = arith.constant 0.000000e+00 : f32
    %6 = vector.broadcast %cst_5 : f32 to vector<8x32xf32>
    %7 = arith.cmpf ogt, %5, %6 : vector<8x32xf32>
    %8 = math.exp %5 : vector<8x32xf32>
    %cst_6 = arith.constant 1.000000e+00 : f32
    %9 = vector.broadcast %cst_6 : f32 to vector<8x32xf32>
    %10 = arith.subf %8, %9 : vector<8x32xf32>
    %11 = arith.select %7, %5, %10 : vector<8x32xi1>, vector<8x32xf32>
    %c0_7 = arith.constant 0 : index
    %c0_8 = arith.constant 0 : index
    %12 = vector.load %arg4[%c0_7, %c0_8] : memref<32x32xf32, #tpu.memory_space<vmem>>, vector<32x32xf32>
    %cst_9 = arith.constant dense<0.000000e+00> : vector<8x32xf32>
    %13 = tpu.matmul %11, %12, %cst_9 {dimension_numbers = #tpu.dot_dimension_numbers<[1], [0], [0], [1], [0, 0, 1, 1], [], []>} : vector<8x32xf32>, vector<32x32xf32>, vector<8x32xf32> -> vector<8x32xf32>
    %c0_10 = arith.constant 0 : index
    %c0_11 = arith.constant 0 : index
    %14 = vector.load %arg5[%c0_10, %c0_11] : memref<1x32xf32, #tpu.memory_space<vmem>>, vector<1x32xf32>
    %15 = vector.broadcast %14 : vector<1x32xf32> to vector<8x32xf32>
    %16 = arith.addf %13, %15 : vector<8x32xf32>
    %cst_12 = arith.constant 0.000000e+00 : f32
    %17 = vector.broadcast %cst_12 : f32 to vector<8x32xf32>
    %18 = arith.cmpf ogt, %16, %17 : vector<8x32xf32>
    %19 = math.exp %16 : vector<8x32xf32>
    %cst_13 = arith.constant 1.000000e+00 : f32
    %20 = vector.broadcast %cst_13 : f32 to vector<8x32xf32>
    %21 = arith.subf %19, %20 : vector<8x32xf32>
    %22 = arith.select %18, %16, %21 : vector<8x32xi1>, vector<8x32xf32>
    %c0_14 = arith.constant 0 : index
    %c0_15 = arith.constant 0 : index
    %23 = vector.load %arg6[%c0_14, %c0_15] : memref<32x4xf32, #tpu.memory_space<vmem>>, vector<32x4xf32>
    %cst_16 = arith.constant dense<0.000000e+00> : vector<8x4xf32>
    %24 = tpu.matmul %22, %23, %cst_16 {dimension_numbers = #tpu.dot_dimension_numbers<[1], [0], [0], [1], [0, 0, 1, 1], [], []>} : vector<8x32xf32>, vector<32x4xf32>, vector<8x4xf32> -> vector<8x4xf32>
    %c0_17 = arith.constant 0 : index
    %c0_18 = arith.constant 0 : index
    %25 = vector.load %arg7[%c0_17, %c0_18] : memref<1x4xf32, #tpu.memory_space<vmem>>, vector<1x4xf32>
    %26 = vector.broadcast %25 : vector<1x4xf32> to vector<8x4xf32>
    %27 = arith.addf %24, %26 : vector<8x4xf32>
    %c0_19 = arith.constant 0 : index
    %c0_20 = arith.constant 0 : index
    %28 = vector.load %arg8[%c0_19, %c0_20] : memref<8x4xf32, #tpu.memory_space<vmem>>, vector<8x4xf32>
    tpu.vector_store %arg8[%c0_19, %c0_20], %27 {strides = array<i32>} : memref<8x4xf32, #tpu.memory_space<vmem>>, vector<8x4xf32>,
    return
  }
  func.func @transform_0(%arg0: i32) -> (i32, i32) {
    %c0_i32 = arith.constant 0 : i32
    %c0_i32_0 = arith.constant 0 : i32
    return %arg0, %c0_i32 : i32, i32
  }
  func.func @transform_1(%arg0: i32) -> (i32, i32) {
    %c0_i32 = arith.constant 0 : i32
    %c0_i32_0 = arith.constant 0 : i32
    %c0_i32_1 = arith.constant 0 : i32
    return %c0_i32, %c0_i32_0 : i32, i32
  }
  func.func @transform_2(%arg0: i32) -> (i32, i32) {
    %c0_i32 = arith.constant 0 : i32
    %c0_i32_0 = arith.constant 0 : i32
    %c0_i32_1 = arith.constant 0 : i32
    return %c0_i32, %c0_i32_0 : i32, i32
  }
  func.func @transform_3(%arg0: i32) -> (i32, i32) {
    %c0_i32 = arith.constant 0 : i32
    %c0_i32_0 = arith.constant 0 : i32
    %c0_i32_1 = arith.constant 0 : i32
    return %c0_i32, %c0_i32_0 : i32, i32
  }
  func.func @transform_4(%arg0: i32) -> (i32, i32) {
    %c0_i32 = arith.constant 0 : i32
    %c0_i32_0 = arith.constant 0 : i32
    %c0_i32_1 = arith.constant 0 : i32
    return %c0_i32, %c0_i32_0 : i32, i32
  }
  func.func @transform_5(%arg0: i32) -> (i32, i32) {
    %c0_i32 = arith.constant 0 : i32
    %c0_i32_0 = arith.constant 0 : i32
    %c0_i32_1 = arith.constant 0 : i32
    return %c0_i32, %c0_i32_0 : i32, i32
  }
  func.func @transform_6(%arg0: i32) -> (i32, i32) {
    %c0_i32 = arith.constant 0 : i32
    %c0_i32_0 = arith.constant 0 : i32
    %c0_i32_1 = arith.constant 0 : i32
    return %c0_i32, %c0_i32_0 : i32, i32
  }
  func.func @transform_7(%arg0: i32) -> (i32, i32) {
    %c0_i32 = arith.constant 0 : i32
    %c0_i32_0 = arith.constant 0 : i32
    return %arg0, %c0_i32 : i32, i32
  }
}

</mosaic_0001>

<bundles_post_ra>
// kernel: tpu_custom_call.1
= control target key start
LH: loop header
LB: loop body
LE: loop exit
PB: predicated region body
PF: predicated region fallthrough
CT: control target
= control target key end

     0   :  { %vm36_vm0 = vcmask 1043456   ;;  %vm32_vm1 = vcmask 31744   ;;  %vm73_vm2 = vcmask 261120   ;;  %s237_s1 = inlined_call_operand.vmem [shape: f32[4,32], index: 1, kind: input, shape index: {}]   ;;  %s238_s0 = inlined_call_operand.vmem [shape: f32[8,4], index: 0, kind: input, shape index: {}]   ;;  %s239_s2 = inlined_call_operand.vmem [shape: f32[1,32], index: 2, kind: input, shape index: {}]   ;;  %s240_s4 = inlined_call_operand.vmem [shape: f32[1,32], index: 4, kind: input, shape index: {}]   ;;  %s241_s3 = inlined_call_operand.vmem [shape: f32[32,32], index: 3, kind: input, shape index: {}]   ;;  %s242_s6 = inlined_call_operand.vmem [shape: f32[1,4], index: 6, kind: input, shape index: {}]   ;;  %s243_s5 = inlined_call_operand.vmem [shape: f32[32,4], index: 5, kind: input, shape index: {}]   ;;  %s244_s7 = inlined_call_operand.vmem [shape: f32[8,4], index: 7, kind: output, shape index: {}]  }
   0x1   :  { %v27_v0 = vld [vmem:[%s237_s1] sm:$0xf]  ;;  %v68_v2 = vld [vmem:[%s241_s3 + $0x18] sm:$0xff]  ;;  %v67_v3 = vld [vmem:[%s241_s3 + $0x10] sm:$0xff] }
   0x2   :  { %v26_v1 = vld [vmem:[%s238_s0] sm:$0xff]  ;;  %138 = vmatpush.msk.msra.mxu0 %vm36_vm0, %v27_v0  ;;  %89 = vmatpush.msra.mxu1 %v68_v2  ;;  %v66_v4 = vld [vmem:[%s241_s3 + $0x8] sm:$0xff]  ;;  %v105_v13 = vld [vmem:[%s243_s5 + $0x18] sm:$0xff] }
   0x3   :  { %139 = vmatmul.msk.f32.vlgmr.msra.gmra.mxu0 %vm32_vm1, %v26_v1  ;;  %v65_v5 = vld [vmem:[%s241_s3] sm:$0xff]  ;;  %v104_v14 = vld [vmem:[%s243_s5 + $0x10] sm:$0xff]  ;;  %125 = vmatpush.msra.mxu2 %v105_v13  ;;  %v103_v15 = vld [vmem:[%s243_s5 + $0x8] sm:$0xff] }
   0x4   :  { %90 = vmatpush.msra.mxu1 %v67_v3  ;;  %v144_v6 = vld [vmem:[%s239_s2] ss:$0 sm:$0xff] }
   0x5   :  { %126 = vmatpush.msra.mxu2 %v104_v14  ;;  %v102_v16 = vld [vmem:[%s243_s5] sm:$0xff] }
   0x6   :  { %91 = vmatpush.msra.mxu1 %v66_v4  ;;  %v145_v17 = vld [vmem:[%s240_s4] ss:$0 sm:$0xff] }
   0x7   :  { %127 = vmatpush.msra.mxu2 %v103_v15  ;;  %v146_v24 = vld [vmem:[%s242_s6] ss:$0 sm:$0xff] }
   0x8   :  { %92 = vmatpush.msra.mxu1 %v65_v5 }
   0x9   :  { %128 = vmatpush.msra.mxu2 %v102_v16 }
  0x80   :  { %v57_v7 = vpop.f32.mrf.mxu0 }
  0x81   :  { %v58_v8 = vadd.f32 %v144_v6, %v57_v7 }
  0x83   :  { %v61_v9 = vmul.f32 1.442695, %v58_v8  ;;  %vm60_vm3 = vcmp.gt.f32.partialorder %v58_v8, 0.0 }
  0x85   :  { %147 = vpow2.f32 %v61_v9 }
  0x8b   :  { %v148_v10 = vpop.eup %147 }
  0x8c   :  { %v140_v11 = vadd.f32 -1.0, %v148_v10 }
  0x8e   :  { %v64_v12 = vsel %vm60_vm3, %v58_v8, %v140_v11 }
  0x8f   :  { %141 = vmatmul.msk.f32.vlgmr.msra.gmra.mxu1 %vm73_vm2, %v64_v12 }
 0x10c   :  { %v94_v18 = vpop.f32.mrf.mxu1 }
 0x10d   :  { %v95_v19 = vadd.f32 %v145_v17, %v94_v18 }
 0x10f   :  { %v98_v20 = vmul.f32 1.442695, %v95_v19  ;;  %vm97_vm4 = vcmp.gt.f32.partialorder %v95_v19, 0.0 }
 0x111   :  { %149 = vpow2.f32 %v98_v20 }
 0x117   :  { %v150_v21 = vpop.eup %149 }
 0x118   :  { %v142_v22 = vadd.f32 -1.0, %v150_v21 }
 0x11a   :  { %v101_v23 = vsel %vm97_vm4, %v95_v19, %v142_v22 }
 0x11b   :  { %143 = vmatmul.msk.f32.vlgmr.msra.gmra.mxu2 %vm73_vm2, %v101_v23 }
 0x19e   :  { %v130_v25 = vpop.f32.mrf.mxu2 }
 0x19f   :  { %v131_v26 = vadd.f32 %v146_v24, %v130_v25 }
 0x1a1   :  { %133 = vst.msk [vmem:[%s244_s7] sm:$0xff] %vm32_vm1, %v131_v26 }

</bundles_post_ra>
